<compile_context>
chip_gen: v7x
topology: tpu7x:2x2x1
jax: 0.10.0
libtpu: 0.0.40
codegen_flags: <defaults>
</compile_context>

<pallas_src>
import jax
import jax.numpy as jnp
import numpy as np
from jax.experimental import pallas as pl
from jax.experimental.pallas import tpu as pltpu

FEATURE_DIM = 2048   # resnet50 fc.in_features
LANE = 128           # TPU lane width
MAX_TILE_N = 512     # max class-axis block (lanes)
MAX_TILE_M = 256     # max batch-axis block (rows)


def _head_kernel(feat_ref, w_ref, b_ref, out_ref):
    """feat_ref: (tm, C) native dtype   w_ref: (C, tn) bf16   b_ref: (1, tn) f32
    out_ref: (tm, tn) caller dtype.  One MXU matmul + bias; f32 accumulation."""
    feat = feat_ref[...].astype(w_ref.dtype)          # in-kernel cast (free on VPU)
    acc = jnp.dot(feat, w_ref[...], preferred_element_type=jnp.float32)
    out_ref[...] = (acc + b_ref[...]).astype(out_ref.dtype)


def prepare_classifier_params(w, b, *, weight_dtype=jnp.bfloat16):
    """One-time (init-time) parameter prep.

    w: (feature_dim, nclasses)  == PyTorch `classifier.weight.T` (note the
       transpose!).  b: (nclasses,).
    Returns (w_padded, b_padded, nclasses) with the class axis zero-padded to a
    multiple of 128 and the weight stored in `weight_dtype`.
    """
    assert w.ndim == 2 and w.shape[0] == FEATURE_DIM, (
        "expected w of shape (feature_dim=2048, nclasses); pass Linear.weight.T")
    nclasses = w.shape[1]
    assert b.shape == (nclasses,)
    n_pad = ((nclasses + LANE - 1) // LANE) * LANE
    w_p = jnp.pad(w.astype(weight_dtype), ((0, 0), (0, n_pad - nclasses)))
    b_p = jnp.pad(b.astype(jnp.float32), (0, n_pad - nclasses)).reshape(1, n_pad)
    return w_p, b_p, nclasses


def _pick_tile(total, maximum, unit):
    """Largest multiple of `unit` that is <= maximum and divides `total`
    (falls back to `total` if nothing divides, i.e. use the full extent)."""
    t = min(maximum, total)
    t = (t // unit) * unit
    while t >= unit:
        if total % t == 0:
            return t
        t -= unit
    return total


def image_classifier_head(features_nchw, w_padded, b_padded, nclasses):
    """features_nchw: (N, 2048, 1, 1) backbone output.
    w_padded/b_padded: from prepare_classifier_params (class axis padded to 128).
    Returns (N, nclasses) logits in the features' dtype."""
    N, C, H, Wd = features_nchw.shape
    assert C == FEATURE_DIM and H == 1 and Wd == 1
    n_pad = w_padded.shape[1]
    out_dtype = features_nchw.dtype

    # avg_pool2d((1,1)) == identity; view(-1, C) == reshape (H=W=1, no transpose).
    feat = features_nchw.reshape(N, C)

    # Tile sizes: lane-dense class blocks, batch blocks aligned to the MXU height
    # when N is large enough; otherwise a single full-extent block.
    tile_n = _pick_tile(n_pad, MAX_TILE_N, LANE)
    tile_m = _pick_tile(N, MAX_TILE_M, 8) if (N >= 8 and N % 8 == 0) else N
    grid = (N // tile_m if tile_m else 1, n_pad // tile_n)

    feat_bytes = feat.dtype.itemsize
    out_bytes = jnp.dtype(out_dtype).itemsize
    cost = pl.CostEstimate(
        flops=2 * N * C * n_pad,
        bytes_accessed=(C * n_pad * w_padded.dtype.itemsize   # weight
                        + N * C * feat_bytes                  # features
                        + 4 * n_pad                           # bias (f32)
                        + N * n_pad * out_bytes),             # output
        transcendentals=0,
    )

    out_padded = pl.pallas_call(
        _head_kernel,
        out_shape=jax.ShapeDtypeStruct((N, n_pad), out_dtype),
        grid_spec=pltpu.PrefetchScalarGridSpec(
            num_scalar_prefetch=0,
            grid=grid,
            in_specs=[
                pl.BlockSpec((tile_m, C), lambda i, j: (i, 0)),
                pl.BlockSpec((C, tile_n), lambda i, j: (0, j)),
                pl.BlockSpec((1, tile_n), lambda i, j: (0, j)),
            ],
            out_specs=pl.BlockSpec((tile_m, tile_n), lambda i, j: (i, j)),
        ),
        compiler_params=pltpu.CompilerParams(
            dimension_semantics=("parallel", "parallel")),
        cost_estimate=cost,
    )(feat, w_padded, b_padded)

    # Strip the lane padding (already in the caller's dtype).
    return out_padded[:, :nclasses]


if __name__ == "__main__":
    key = jax.random.PRNGKey(0)
    kf, kw, kb = jax.random.split(key, 3)

    N, nclasses = 2, 10

    # Synthetic backbone output (what resnet50's global pool would produce).
    features = jax.random.normal(kf, (N, FEATURE_DIM, 1, 1), dtype=jnp.float32)

    # Deterministic classifier init (PyTorch Linear default: U(-1/sqrt(fan_in), +)).
    bound = 1.0 / np.sqrt(FEATURE_DIM)
    w = jax.random.uniform(kw, (FEATURE_DIM, nclasses), jnp.float32, -bound, bound)
    b = jax.random.uniform(kb, (nclasses,), jnp.float32, -bound, bound)

    # Init-time prep (done once, off the per-call path).
    w_p, b_p, nc = prepare_classifier_params(w, b)

    out = jax.block_until_ready(image_classifier_head(features, w_p, b_p, nc))

    # Pure-JAX f32 reference of the head (bf16 MXU operands -> loose-ish tolerance).
    ref = features.reshape(N, FEATURE_DIM) @ w + b
    np.testing.assert_allclose(np.asarray(out), np.asarray(ref), rtol=2e-2, atol=2e-2)
    assert out.shape == (N, nclasses)
    assert out.dtype == features.dtype
    print("KERNEL_OK")
</pallas_src>

<mosaic_0001>
module attributes {stable_mosaic.version = 11 : i64} {
  func.func @_head_kernel(%arg0: i32, %arg1: i32, %arg2: memref<2x2048xf32, #tpu.memory_space<vmem>>, %arg3: memref<2048x128xbf16, #tpu.memory_space<vmem>>, %arg4: memref<1x128xf32, #tpu.memory_space<vmem>>, %arg5: memref<2x128xf32, #tpu.memory_space<vmem>>) attributes {dimension_semantics = [#tpu.dimension_semantics<parallel>, #tpu.dimension_semantics<parallel>], iteration_bounds = array<i64: 1, 1>, scalar_prefetch = 0 : i64, scratch_operands = 0 : i64, tpu.core_type = #tpu.core_type<tc>, window_params = [{transform_indices = @transform_0, window_bounds = array<i64: 2, 2048>}, {transform_indices = @transform_1, window_bounds = array<i64: 2048, 128>}, {transform_indices = @transform_2, window_bounds = array<i64: 1, 128>}, {transform_indices = @transform_3, window_bounds = array<i64: 2, 128>}]} {
    %c0 = arith.constant 0 : index
    %c0_0 = arith.constant 0 : index
    %0 = vector.load %arg2[%c0, %c0_0] : memref<2x2048xf32, #tpu.memory_space<vmem>>, vector<2x2048xf32>
    %1 = arith.truncf %0 : vector<2x2048xf32> to vector<2x2048xbf16>
    %c0_1 = arith.constant 0 : index
    %c0_2 = arith.constant 0 : index
    %2 = vector.load %arg3[%c0_1, %c0_2] : memref<2048x128xbf16, #tpu.memory_space<vmem>>, vector<2048x128xbf16>
    %cst = arith.constant dense<0.000000e+00> : vector<2x128xf32>
    %3 = tpu.matmul %1, %2, %cst {dimension_numbers = #tpu.dot_dimension_numbers<[1], [0], [0], [1], [0, 0, 1, 1], [], []>} : vector<2x2048xbf16>, vector<2048x128xbf16>, vector<2x128xf32> -> vector<2x128xf32>
    %c0_3 = arith.constant 0 : index
    %c0_4 = arith.constant 0 : index
    %4 = vector.load %arg4[%c0_3, %c0_4] : memref<1x128xf32, #tpu.memory_space<vmem>>, vector<1x128xf32>
    %5 = vector.broadcast %4 : vector<1x128xf32> to vector<2x128xf32>
    %6 = arith.addf %3, %5 : vector<2x128xf32>
    %c0_5 = arith.constant 0 : index
    %c0_6 = arith.constant 0 : index
    %7 = vector.load %arg5[%c0_5, %c0_6] : memref<2x128xf32, #tpu.memory_space<vmem>>, vector<2x128xf32>
    tpu.vector_store %arg5[%c0_5, %c0_6], %6 {strides = array<i32>} : memref<2x128xf32, #tpu.memory_space<vmem>>, vector<2x128xf32>,
    return
  }
  func.func @transform_0(%arg0: i32, %arg1: i32) -> (i32, i32) {
    %c0_i32 = arith.constant 0 : i32
    %c0_i32_0 = arith.constant 0 : i32
    return %arg0, %c0_i32 : i32, i32
  }
  func.func @transform_1(%arg0: i32, %arg1: i32) -> (i32, i32) {
    %c0_i32 = arith.constant 0 : i32
    %c0_i32_0 = arith.constant 0 : i32
    return %c0_i32, %arg1 : i32, i32
  }
  func.func @transform_2(%arg0: i32, %arg1: i32) -> (i32, i32) {
    %c0_i32 = arith.constant 0 : i32
    %c0_i32_0 = arith.constant 0 : i32
    return %c0_i32, %arg1 : i32, i32
  }
  func.func @transform_3(%arg0: i32, %arg1: i32) -> (i32, i32) {
    %c0_i32 = arith.constant 0 : i32
    return %arg0, %arg1 : i32, i32
  }
}

</mosaic_0001>

<bundles_post_ra>
// kernel: tpu_custom_call.1
= control target key start
LH: loop header
LB: loop body
LE: loop exit
PB: predicated region body
PF: predicated region fallthrough
CT: control target
= control target key end

     0   :  { %8 = vsyncpa [#allocation3], 0  ;;  %s2115_s0 = inlined_call_operand.hbm [shape: f32[2,2048], index: 0, kind: input, shape index: {}]   ;;  %s2116_s1 = inlined_call_operand.hbm [shape: bf16[2048,128], index: 1, kind: input, shape index: {}]   ;;  %s2117_s2 = inlined_call_operand.vmem [shape: f32[1,128], index: 2, kind: input, shape index: {}]   ;;  %s2118_s3 = inlined_call_operand.hbm [shape: f32[2,128], index: 3, kind: output, shape index: {}]  }
   0x1   :  { %9 = vsyncpa [#allocation6], 0 }
   0x2   :  { %10 = vsyncpa [#allocation4], 0  ;;  %s2033_s12 = smov [#allocation2]   ;;  %s2034_s14 = smov [#allocation5]  }
   0x3   :  { %s17_s13 = sshll.u32 %s2033_s12, 4  ;;  %s26_s15 = sshll.u32 %s2034_s14, 4  ;;  %s18_s13 = int_to_ptr.vmem [resolvable:$true] %s17_s13  ;;  %s2059_s15 = int_to_ptr.vmem [resolvable:$true] %s26_s15 }
   0x4   :  { %s1961_s18 = scalar_lea.hbm %s2115_s0, 512 }
   0x5   :  { %p1962_p0 = scmp.ne.s32.totalorder %s2115_s0, %s1961_s18  ;;  %p1965_p1 = scmp.lt.u32.totalorder %s1961_s18, %s2115_s0 }
   0x7   :  { %p1967_p2 = pnand %p1965_p1, %p1962_p0 }
   0x9   :  { %1970 = shalt.err (!%p1967_p2)
}
   0xa   :  { %s1971_s23 = scalar_lea.vmem %s18_s13, 512  ;;  %p1976_p4 = scmp.lt.s32.totalorder %s18_s13, %s18_s13 }
   0xb   :  { %p1972_p3 = scmp.ne.s32.totalorder %s18_s13, %s1971_s23  ;;  %p1977_p5 = scmp.lt.s32.totalorder %s1971_s23, %s1971_s23 }
   0xd   :  { %p1978_p6 = por %p1977_p5, %p1976_p4 }
   0xf   :  { %p1979_p7 = pnand %p1978_p6, %p1972_p3 }
  0x11   :  { %1982 = shalt.err (!%p1979_p7)
}
  0x12   :  { %20 = dma.hbm_to_vmem [thread:$0]  %s2115_s0, 512, %s18_s13, [#allocation3]  }
  0x13   :  { %s1983_s28 = scalar_lea.hbm %s2116_s1, 16384 }
  0x14   :  { %p1984_p8 = scmp.ne.s32.totalorder %s2116_s1, %s1983_s28  ;;  %p1987_p9 = scmp.lt.u32.totalorder %s1983_s28, %s2116_s1 }
  0x16   :  { %p1989_p10 = pnand %p1987_p9, %p1984_p8 }
  0x18   :  { %1992 = shalt.err (!%p1989_p10)
}
  0x19   :  { %s1993_s6 = scalar_lea.vmem %s2059_s15, 16384  ;;  %p1998_p12 = scmp.lt.s32.totalorder %s2059_s15, %s2059_s15 }
  0x1a   :  { %p1994_p11 = scmp.ne.s32.totalorder %s2059_s15, %s1993_s6  ;;  %p1999_p13 = scmp.lt.s32.totalorder %s1993_s6, %s1993_s6 }
  0x1c   :  { %p2000_p0 = por %p1999_p13, %p1998_p12 }
  0x1e   :  { %p2001_p1 = pnand %p2000_p0, %p1994_p11 }
  0x20   :  { %2004 = shalt.err (!%p2001_p1)
}
  0x21   :  { %s2035_s0 = smov 64   ;;  %s2036_s7 = smov 4  }
  0x22   :  { %32 = dma.hbm_to_vmem [thread:$0]  %s2116_s1, 16384, %s2059_s15, [#allocation6], %s2035_s0, %s2035_s0, %s2036_s7  }
  0x23   :  { %2027 = dma.done.wait [#allocation3], 512  }
  0x24   :  { %2028 = vsyncadd [#allocation3], 4294966784 }
  0x25   :  { %2029 = dma.done.wait [#allocation6], 16384  }
  0x26   :  { %2030 = vsyncadd [#allocation6], 4294950912  ;;  %v1829_v0 = vld [vmem:[#allocation5 + $0x40] sm:$0xff]   ;;  %v1833_v4 = vld [vmem:[#allocation5 + $0x48] sm:$0xff]   ;;  %v2037_v22 = vmov 1983009808   ;;  %v54_v24 = vlaneseq }
  0x27   :  { %v1830_v1 = vld [vmem:[#allocation5 + $0xc0] sm:$0xff]   ;;  %1647 = vmatprep.subr.bf16.mxu0 %v1829_v0  ;;  %v1834_v5 = vld [vmem:[#allocation5 + $0xc8] sm:$0xff]   ;;  %v1837_v8 = vld [vmem:[#allocation5 + $0x50] sm:$0xff]   ;;  %v52_v23 = vunpack.c.l.s4 %v2037_v22 }
  0x28   :  { %v1831_v2 = vld [vmem:[#allocation5] sm:$0xff]   ;;  %1669 = vmatprep.subr.bf16.mxu1 %v1830_v1  ;;  %v1835_v6 = vld [vmem:[#allocation5 + $0x8] sm:$0xff]   ;;  %v1838_v9 = vld [vmem:[#allocation5 + $0xd0] sm:$0xff]   ;;  %v55_v30 = vshrl.u32 %v54_v24, 7 }
  0x29   :  { %v1832_v3 = vld [vmem:[#allocation5 + $0x80] sm:$0xff]   ;;  %1648 = vmatpush3.bf16.msra.mxu0 %v1831_v2  ;;  %v1836_v7 = vld [vmem:[#allocation5 + $0x88] sm:$0xff]   ;;  %v1839_v10 = vld [vmem:[#allocation5 + $0x10] sm:$0xff]   ;;  %v53_v29 = vunpack.c.0.s8 %v52_v23 }
  0x2a   :  { %1670 = vmatpush3.bf16.msra.mxu1 %v1832_v3  ;;  %1649 = vmatprep.subr.bf16.mxu0 %v1833_v4  ;;  %v1840_v11 = vld [vmem:[#allocation5 + $0x90] sm:$0xff]   ;;  %v1841_v12 = vld [vmem:[#allocation5 + $0x58] sm:$0xff]   ;;  %v1845_v16 = vld [vmem:[#allocation5 + $0x60] sm:$0xff]  }
  0x2b   :  { %1671 = vmatprep.subr.bf16.mxu1 %v1834_v5  ;;  %v1842_v13 = vld [vmem:[#allocation5 + $0xd8] sm:$0xff]   ;;  %v1846_v17 = vld [vmem:[#allocation5 + $0xe0] sm:$0xff]   ;;  %v1849_v20 = vld [vmem:[#allocation5 + $0x68] sm:$0xff]   ;;  %v2090_v35 = vsub.s32 %v53_v29, %v55_v30 }
  0x2c   :  { %v1843_v14 = vld [vmem:[#allocation5 + $0x18] sm:$0xff]   ;;  %v1847_v18 = vld [vmem:[#allocation5 + $0x20] sm:$0xff]   ;;  %v1850_v21 = vld [vmem:[#allocation5 + $0xe8] sm:$0xff]  }
  0x2d   :  { %1650 = vmatpush3.bf16.msra.mxu0 %v1835_v6  ;;  %v1844_v15 = vld [vmem:[#allocation5 + $0x98] sm:$0xff]   ;;  %v1848_v19 = vld [vmem:[#allocation5 + $0xa0] sm:$0xff]   ;;  %v1851_v25 = vld [vmem:[#allocation5 + $0x28] sm:$0xff]  }
  0x2e   :  { %1672 = vmatpush3.bf16.msra.mxu1 %v1836_v7  ;;  %1651 = vmatprep.subr.bf16.mxu0 %v1837_v8  ;;  %v1852_v26 = vld [vmem:[#allocation5 + $0xa8] sm:$0xff]   ;;  %v1853_v27 = vld [vmem:[#allocation5 + $0x70] sm:$0xff]   ;;  %v1857_v33 = vld [vmem:[#allocation5 + $0x78] sm:$0xff]  }
  0x2f   :  { %1673 = vmatprep.subr.bf16.mxu1 %v1838_v9  ;;  %v1854_v28 = vld [vmem:[#allocation5 + $0xf0] sm:$0xff]   ;;  %v1858_v34 = vld [vmem:[#allocation5 + $0xf8] sm:$0xff]   ;;  %v42_v38 = vld [vmem:[#allocation2] sm:$0xff] }
  0x30   :  { %v1855_v31 = vld [vmem:[#allocation5 + $0x30] sm:$0xff]   ;;  %v1859_v36 = vld [vmem:[#allocation5 + $0x38] sm:$0xff]   ;;  %v57_v39 = vrot.slane %v42_v38, %v2090_v35  ;;  %v50_v40 = vcombine.high %v42_v38, %v42_v38  ;;  %v1862_v41 = vld [vmem:[#allocation5 + $0x140] sm:$0xff]  }
  0x31   :  { %1652 = vmatpush3.bf16.msra.mxu0 %v1839_v10  ;;  %v1856_v32 = vld [vmem:[#allocation5 + $0xb0] sm:$0xff]   ;;  %v1860_v37 = vld [vmem:[#allocation5 + $0xb8] sm:$0xff]   ;;  %v1863_v42 = vld [vmem:[#allocation5 + $0x1c0] sm:$0xff]  }
  0x32   :  { %1674 = vmatpush3.bf16.msra.mxu1 %v1840_v11  ;;  %1653 = vmatprep.subr.bf16.mxu0 %v1841_v12  ;;  %v65_v43 = vcombine.high %v57_v39, %v57_v39  ;;  %v64_v44 = vrot.slane %v50_v40, %v2090_v35  ;;  %v134_v45 = vpack.c.bf16 %v57_v39, %v57_v39  ;;  %v1864_v48 = vld [vmem:[#allocation5 + $0x100] sm:$0xff]   ;;  %v1866_v50 = vld [vmem:[#allocation5 + $0x148] sm:$0xff]   ;;  %v1870_v55 = vld [vmem:[#allocation5 + $0x150] sm:$0xff]  }
  0x33   :  { %1675 = vmatprep.subr.bf16.mxu1 %v1842_v13  ;;  %v1865_v52 = vld [vmem:[#allocation5 + $0x180] sm:$0xff]   ;;  %v1867_v53 = vld [vmem:[#allocation5 + $0x1c8] sm:$0xff]   ;;  %v1871_v57 = vld [vmem:[#allocation5 + $0x1d0] sm:$0xff]  }
  0x34   :  { %v135_v46 = vpack.c.bf16 %v65_v43, %v65_v43  ;;  %v66_v47 = vcombine.high %v64_v44, %v64_v44  ;;  %v136_v49 = vpack.c.bf16 %v64_v44, %v64_v44  ;;  %v1868_v54 = vld [vmem:[#allocation5 + $0x108] sm:$0xff]   ;;  %v1872_v58 = vld [vmem:[#allocation5 + $0x110] sm:$0xff]   ;;  %v1874_v59 = vld [vmem:[#allocation5 + $0x158] sm:$0xff]  }
  0x35   :  { %1654 = vmatpush3.bf16.msra.mxu0 %v1843_v14  ;;  %v1869_v56 = vld [vmem:[#allocation5 + $0x188] sm:$0xff]   ;;  %v1873_v60 = vld [vmem:[#allocation5 + $0x190] sm:$0xff]   ;;  %v1875_v61 = vld [vmem:[#allocation5 + $0x1d8] sm:$0xff]  }
  0x36   :  { %1676 = vmatpush3.bf16.msra.mxu1 %v1844_v15  ;;  %1655 = vmatprep.subr.bf16.mxu0 %v1845_v16  ;;  %v137_v51 = vpack.c.bf16 %v66_v47, %v66_v47  ;;  %v1876_v62 = vld [vmem:[#allocation5 + $0x118] sm:$0xff]   ;;  %v1878_v63 = vld [vmem:[#allocation5 + $0x160] sm:$0xff]   ;;  %v1882_v3 = vld [vmem:[#allocation5 + $0x168] sm:$0xff]  }
  0x37   :  { %1677 = vmatprep.subr.bf16.mxu1 %v1846_v17  ;;  %1213 = vmatprep.mubr.bf16.mxu0 %v135_v46  ;;  %v1877_v0 = vld [vmem:[#allocation5 + $0x198] sm:$0xff]   ;;  %v1879_v1 = vld [vmem:[#allocation5 + $0x1e0] sm:$0xff]   ;;  %v1883_v5 = vld [vmem:[#allocation5 + $0x1e8] sm:$0xff]  }
  0x38   :  { %1253 = vmatprep.mubr.bf16.mxu1 %v137_v51  ;;  %v1880_v2 = vld [vmem:[#allocation5 + $0x120] sm:$0xff]   ;;  %v1884_v6 = vld [vmem:[#allocation5 + $0x128] sm:$0xff]   ;;  %v1886_v7 = vld [vmem:[#allocation5 + $0x170] sm:$0xff]  }
  0x39   :  { %1656 = vmatpush3.bf16.msra.mxu0 %v1847_v18  ;;  %v1881_v4 = vld [vmem:[#allocation5 + $0x1a0] sm:$0xff]   ;;  %v1885_v8 = vld [vmem:[#allocation5 + $0x1a8] sm:$0xff]   ;;  %v1887_v9 = vld [vmem:[#allocation5 + $0x1f0] sm:$0xff]  }
  0x3a   :  { %1678 = vmatpush3.bf16.msra.mxu1 %v1848_v19  ;;  %1657 = vmatprep.subr.bf16.mxu0 %v1849_v20  ;;  %v1888_v10 = vld [vmem:[#allocation5 + $0x130] sm:$0xff]   ;;  %v1890_v11 = vld [vmem:[#allocation5 + $0x178] sm:$0xff]   ;;  %v43_v14 = vld [vmem:[#allocation2 + $0x8] sm:$0xff] }
  0x3b   :  { %1679 = vmatprep.subr.bf16.mxu1 %v1850_v21  ;;  %v1889_v12 = vld [vmem:[#allocation5 + $0x1b0] sm:$0xff]   ;;  %v1891_v13 = vld [vmem:[#allocation5 + $0x1f8] sm:$0xff]   ;;  %v74_v16 = vrot.slane %v43_v14, %v2090_v35  ;;  %v67_v17 = vcombine.high %v43_v14, %v43_v14  ;;  %v1895_v18 = vld [vmem:[#allocation5 + $0x240] sm:$0xff]  }
  0x3c   :  { %v1892_v15 = vld [vmem:[#allocation5 + $0x138] sm:$0xff]   ;;  %v1896_v23 = vld [vmem:[#allocation5 + $0x2c0] sm:$0xff]   ;;  %v1906_v39 = vld [vmem:[#allocation5 + $0x290] sm:$0xff]  }
  0x3d   :  { %1658 = vmatpush3.bf16.msra.mxu0 %v1851_v25  ;;  %v1893_v19 = vld [vmem:[#allocation5 + $0x1b8] sm:$0xff]   ;;  %v82_v20 = vcombine.high %v74_v16, %v74_v16  ;;  %v81_v21 = vrot.slane %v67_v17, %v2090_v35  ;;  %v138_v22 = vpack.c.bf16 %v74_v16, %v74_v16  ;;  %v1898_v30 = vld [vmem:[#allocation5 + $0x280] sm:$0xff]   ;;  %v1915_v46 = vld [vmem:[#allocation5 + $0x268] sm:$0xff]  }
  0x3e   :  { %1680 = vmatpush3.bf16.msra.mxu1 %v1852_v26  ;;  %1659 = vmatprep.subr.bf16.mxu0 %v1853_v27  ;;  %v1897_v26 = vld [vmem:[#allocation5 + $0x200] sm:$0xff]   ;;  %v1907_v38 = vld [vmem:[#allocation5 + $0x258] sm:$0xff]   ;;  %v1918_v51 = vld [vmem:[#allocation5 + $0x2a8] sm:$0xff]  }
  0x3f   :  { %1681 = vmatprep.subr.bf16.mxu1 %v1854_v28  ;;  %v139_v24 = vpack.c.bf16 %v82_v20, %v82_v20  ;;  %v83_v25 = vcombine.high %v81_v21, %v81_v21  ;;  %v140_v27 = vpack.c.bf16 %v81_v21, %v81_v21  ;;  %v1899_v28 = vld [vmem:[#allocation5 + $0x248] sm:$0xff]   ;;  %v1908_v40 = vld [vmem:[#allocation5 + $0x2d8] sm:$0xff]   ;;  %v1912_v44 = vld [vmem:[#allocation5 + $0x2e0] sm:$0xff]  }
  0x40   :  { %v1910_v43 = vld [vmem:[#allocation5 + $0x298] sm:$0xff]   ;;  %v1914_v47 = vld [vmem:[#allocation5 + $0x2a0] sm:$0xff]   ;;  %v1937_v14 = vld [vmem:[#allocation5 + $0x3d0] sm:$0xff]  }
  0x41   :  { %1660 = vmatpush3.bf16.msra.mxu0 %v1855_v31  ;;  %v141_v29 = vpack.c.bf16 %v83_v25, %v83_v25  ;;  %v1900_v31 = vld [vmem:[#allocation5 + $0x2c8] sm:$0xff]   ;;  %v1940_v16 = vld [vmem:[#allocation5 + $0x358] sm:$0xff]   ;;  %v1939_v17 = vld [vmem:[#allocation5 + $0x390] sm:$0xff]  }
  0x42   :  { %1682 = vmatpush3.bf16.msra.mxu1 %v1856_v32  ;;  %1661 = vmatprep.subr.bf16.mxu0 %v1857_v33  ;;  %v1901_v32 = vld [vmem:[#allocation5 + $0x208] sm:$0xff]   ;;  %v1903_v33 = vld [vmem:[#allocation5 + $0x250] sm:$0xff]   ;;  %v1944_v20 = vld [vmem:[#allocation5 + $0x360] sm:$0xff]  }
  0x43   :  { %1683 = vmatprep.subr.bf16.mxu1 %v1858_v34  ;;  %v1902_v34 = vld [vmem:[#allocation5 + $0x288] sm:$0xff]   ;;  %v1943_v21 = vld [vmem:[#allocation5 + $0x398] sm:$0xff]   ;;  %v1947_v25 = vld [vmem:[#allocation5 + $0x3a0] sm:$0xff]  }
  0x45   :  { %1662 = vmatpush3.bf16.msra.mxu0 %v1859_v36  ;;  %v1904_v36 = vld [vmem:[#allocation5 + $0x2d0] sm:$0xff]  }
  0x46   :  { %1684 = vmatpush3.bf16.msra.mxu1 %v1860_v37  ;;  %1691 = vmatprep.subr.bf16.mxu0 %v1862_v41  ;;  %v1905_v37 = vld [vmem:[#allocation5 + $0x210] sm:$0xff]   ;;  %v1909_v41 = vld [vmem:[#allocation5 + $0x218] sm:$0xff]  }
  0x47   :  { %1713 = vmatprep.subr.bf16.mxu1 %v1863_v42  ;;  %v1911_v42 = vld [vmem:[#allocation5 + $0x260] sm:$0xff]  }
  0x48   :  { %1214 = vmatmul.mubr.bf16.vlgmr.msra.gmra.mrb[0].mxu0 %v134_v45  ;;  %v1913_v45 = vld [vmem:[#allocation5 + $0x220] sm:$0xff]  }
  0x49   :  { %1692 = vmatpush3.bf16.msra.mxu0 %v1864_v48  ;;  %1254 = vmatmul.mubr.bf16.vlgmr.msra.gmra.mrb[0].mxu1 %v136_v49  ;;  %v1916_v48 = vld [vmem:[#allocation5 + $0x2e8] sm:$0xff]  }
  0x4a   :  { %1693 = vmatprep.subr.bf16.mxu0 %v1866_v50  ;;  %1714 = vmatpush3.bf16.msra.mxu1 %v1865_v52  ;;  %v1917_v49 = vld [vmem:[#allocation5 + $0x228] sm:$0xff]   ;;  %v1919_v50 = vld [vmem:[#allocation5 + $0x270] sm:$0xff]  }
  0x4b   :  { %1715 = vmatprep.subr.bf16.mxu1 %v1867_v53  ;;  %1293 = vmatprep.mubr.bf16.mxu0 %v139_v24  ;;  %v1920_v52 = vld [vmem:[#allocation5 + $0x2f0] sm:$0xff]   ;;  %v1948_v24 = vld [vmem:[#allocation5 + $0x368] sm:$0xff]  }
  0x4c   :  { %1333 = vmatprep.mubr.bf16.mxu1 %v141_v29  ;;  %v1921_v53 = vld [vmem:[#allocation5 + $0x230] sm:$0xff]   ;;  %v1951_v29 = vld [vmem:[#allocation5 + $0x3a8] sm:$0xff]  }
  0x4d   :  { %1694 = vmatpush3.bf16.msra.mxu0 %v1868_v54  ;;  %v1923_v54 = vld [vmem:[#allocation5 + $0x278] sm:$0xff]  }
  0x4e   :  { %1695 = vmatprep.subr.bf16.mxu0 %v1870_v55  ;;  %1716 = vmatpush3.bf16.msra.mxu1 %v1869_v56  ;;  %v1922_v55 = vld [vmem:[#allocation5 + $0x2b0] sm:$0xff]   ;;  %v1924_v56 = vld [vmem:[#allocation5 + $0x2f8] sm:$0xff]  }
  0x4f   :  { %1717 = vmatprep.subr.bf16.mxu1 %v1871_v57  ;;  %v44_v57 = vld [vmem:[#allocation2 + $0x10] sm:$0xff] }
  0x51   :  { %1696 = vmatpush3.bf16.msra.mxu0 %v1872_v58  ;;  %v1925_v58 = vld [vmem:[#allocation5 + $0x238] sm:$0xff]  }
  0x52   :  { %1697 = vmatprep.subr.bf16.mxu0 %v1874_v59  ;;  %1718 = vmatpush3.bf16.msra.mxu1 %v1873_v60  ;;  %v91_v59 = vrot.slane %v44_v57, %v2090_v35  ;;  %v84_v60 = vcombine.high %v44_v57, %v44_v57 }
  0x53   :  { %1719 = vmatprep.subr.bf16.mxu1 %v1875_v61  ;;  %v1928_v61 = vld [vmem:[#allocation5 + $0x340] sm:$0xff]  }
  0x55   :  { %1698 = vmatpush3.bf16.msra.mxu0 %v1876_v62  ;;  %v1926_v62 = vld [vmem:[#allocation5 + $0x2b8] sm:$0xff]  }
  0x56   :  { %1699 = vmatprep.subr.bf16.mxu0 %v1878_v63  ;;  %1720 = vmatpush3.bf16.msra.mxu1 %v1877_v0  ;;  %v99_v63 = vcombine.high %v91_v59, %v91_v59  ;;  %v98_v0 = vrot.slane %v84_v60, %v2090_v35 }
  0x57   :  { %1721 = vmatprep.subr.bf16.mxu1 %v1879_v1  ;;  %v142_v1 = vpack.c.bf16 %v91_v59, %v91_v59 }
  0x59   :  { %1700 = vmatpush3.bf16.msra.mxu0 %v1880_v2  ;;  %v1929_v2 = vld [vmem:[#allocation5 + $0x3c0] sm:$0xff]  }
  0x5a   :  { %1701 = vmatprep.subr.bf16.mxu0 %v1882_v3  ;;  %1722 = vmatpush3.bf16.msra.mxu1 %v1881_v4  ;;  %v143_v3 = vpack.c.bf16 %v99_v63, %v99_v63  ;;  %v100_v4 = vcombine.high %v98_v0, %v98_v0 }
  0x5b   :  { %1723 = vmatprep.subr.bf16.mxu1 %v1883_v5  ;;  %v1930_v5 = vld [vmem:[#allocation5 + $0x300] sm:$0xff]  }
  0x5d   :  { %1702 = vmatpush3.bf16.msra.mxu0 %v1884_v6  ;;  %v144_v6 = vpack.c.bf16 %v98_v0, %v98_v0 }
  0x5e   :  { %1703 = vmatprep.subr.bf16.mxu0 %v1886_v7  ;;  %1724 = vmatpush3.bf16.msra.mxu1 %v1885_v8  ;;  %v1932_v7 = vld [vmem:[#allocation5 + $0x348] sm:$0xff]   ;;  %v145_v8 = vpack.c.bf16 %v100_v4, %v100_v4 }
  0x5f   :  { %1725 = vmatprep.subr.bf16.mxu1 %v1887_v9  ;;  %v1931_v9 = vld [vmem:[#allocation5 + $0x380] sm:$0xff]  }
  0x61   :  { %1704 = vmatpush3.bf16.msra.mxu0 %v1888_v10  ;;  %v1933_v10 = vld [vmem:[#allocation5 + $0x3c8] sm:$0xff]  }
  0x62   :  { %1705 = vmatprep.subr.bf16.mxu0 %v1890_v11  ;;  %1726 = vmatpush3.bf16.msra.mxu1 %v1889_v12  ;;  %v1934_v11 = vld [vmem:[#allocation5 + $0x308] sm:$0xff]   ;;  %v1936_v12 = vld [vmem:[#allocation5 + $0x350] sm:$0xff]  }
  0x63   :  { %1727 = vmatprep.subr.bf16.mxu1 %v1891_v13  ;;  %v1935_v13 = vld [vmem:[#allocation5 + $0x388] sm:$0xff]  }
  0x65   :  { %1706 = vmatpush3.bf16.msra.mxu0 %v1892_v15  ;;  %v1938_v15 = vld [vmem:[#allocation5 + $0x310] sm:$0xff]  }
  0x66   :  { %1735 = vmatprep.subr.bf16.mxu0 %v1895_v18  ;;  %1728 = vmatpush3.bf16.msra.mxu1 %v1893_v19  ;;  %v1941_v18 = vld [vmem:[#allocation5 + $0x3d8] sm:$0xff]  }
  0x67   :  { %1757 = vmatprep.subr.bf16.mxu1 %v1896_v23  ;;  %v1942_v19 = vld [vmem:[#allocation5 + $0x318] sm:$0xff]   ;;  %v1946_v23 = vld [vmem:[#allocation5 + $0x320] sm:$0xff]  }
  0x68   :  { %1294 = vmatmul.mubr.bf16.vlgmr.msra.gmra.mrb[4].mxu0 %v138_v22  ;;  %v1945_v22 = vld [vmem:[#allocation5 + $0x3e0] sm:$0xff]  }
  0x69   :  { %1736 = vmatpush3.bf16.msra.mxu0 %v1897_v26  ;;  %1334 = vmatmul.mubr.bf16.vlgmr.msra.gmra.mrb[4].mxu1 %v140_v27  ;;  %v1949_v26 = vld [vmem:[#allocation5 + $0x3e8] sm:$0xff]  }
  0x6a   :  { %1737 = vmatprep.subr.bf16.mxu0 %v1899_v28  ;;  %1758 = vmatpush3.bf16.msra.mxu1 %v1898_v30  ;;  %v1950_v27 = vld [vmem:[#allocation5 + $0x328] sm:$0xff]   ;;  %v1952_v28 = vld [vmem:[#allocation5 + $0x370] sm:$0xff]  }
  0x6b   :  { %1759 = vmatprep.subr.bf16.mxu1 %v1900_v31  ;;  %1373 = vmatprep.mubr.bf16.mxu0 %v143_v3  ;;  %v1953_v30 = vld [vmem:[#allocation5 + $0x3f0] sm:$0xff]  }
  0x6c   :  { %1413 = vmatprep.mubr.bf16.mxu1 %v145_v8  ;;  %v1954_v31 = vld [vmem:[#allocation5 + $0x330] sm:$0xff]  }
  0x6d   :  { %1738 = vmatpush3.bf16.msra.mxu0 %v1901_v32  ;;  %v1956_v32 = vld [vmem:[#allocation5 + $0x378] sm:$0xff]  }
  0x6e   :  { %1739 = vmatprep.subr.bf16.mxu0 %v1903_v33  ;;  %1760 = vmatpush3.bf16.msra.mxu1 %v1902_v34  ;;  %v1955_v33 = vld [vmem:[#allocation5 + $0x3b0] sm:$0xff]   ;;  %v1957_v34 = vld [vmem:[#allocation5 + $0x3f8] sm:$0xff]  }
  0x6f   :  { %1761 = vmatprep.subr.bf16.mxu1 %v1904_v36  ;;  %v1958_v36 = vld [vmem:[#allocation5 + $0x338] sm:$0xff]  }
  0x71   :  { %1740 = vmatpush3.bf16.msra.mxu0 %v1905_v37  ;;  %v45_v37 = vld [vmem:[#allocation2 + $0x18] sm:$0xff] }
  0x72   :  { %1741 = vmatprep.subr.bf16.mxu0 %v1907_v38  ;;  %1762 = vmatpush3.bf16.msra.mxu1 %v1906_v39  ;;  %v108_v38 = vrot.slane %v45_v37, %v2090_v35  ;;  %v101_v39 = vcombine.high %v45_v37, %v45_v37 }
  0x73   :  { %1763 = vmatprep.subr.bf16.mxu1 %v1908_v40  ;;  %v1959_v40 = vld [vmem:[#allocation5 + $0x3b8] sm:$0xff]  }
  0x75   :  { %1742 = vmatpush3.bf16.msra.mxu0 %v1909_v41  ;;  %v116_v41 = vcombine.high %v108_v38, %v108_v38 }
  0x76   :  { %1743 = vmatprep.subr.bf16.mxu0 %v1911_v42  ;;  %1764 = vmatpush3.bf16.msra.mxu1 %v1910_v43  ;;  %v115_v42 = vrot.slane %v101_v39, %v2090_v35  ;;  %v146_v43 = vpack.c.bf16 %v108_v38, %v108_v38 }
  0x77   :  { %1765 = vmatprep.subr.bf16.mxu1 %v1912_v44  ;;  %v147_v44 = vpack.c.bf16 %v116_v41, %v116_v41 }
  0x79   :  { %1744 = vmatpush3.bf16.msra.mxu0 %v1913_v45  ;;  %v117_v45 = vcombine.high %v115_v42, %v115_v42 }
  0x7a   :  { %1745 = vmatprep.subr.bf16.mxu0 %v1915_v46  ;;  %1766 = vmatpush3.bf16.msra.mxu1 %v1914_v47  ;;  %v148_v46 = vpack.c.bf16 %v115_v42, %v115_v42 }
  0x7b   :  { %1767 = vmatprep.subr.bf16.mxu1 %v1916_v48  ;;  %v149_v47 = vpack.c.bf16 %v117_v45, %v117_v45 }
  0x7d   :  { %1746 = vmatpush3.bf16.msra.mxu0 %v1917_v49  ;;  %v1518_v49 = vld [vmem:[%s2117_s2] ss:$0 sm:$0xff]  ;;  %s2038_s2 = smov [#allocation7]  }
  0x7e   :  { %1747 = vmatprep.subr.bf16.mxu0 %v1919_v50  ;;  %1768 = vmatpush3.bf16.msra.mxu1 %v1918_v51  ;;  %s1508_s11 = sshll.u32 %s2038_s2, 4  ;;  %s1509_s11 = int_to_ptr.vmem [resolvable:$true] %s1508_s11 }
  0x7f   :  { %1769 = vmatprep.subr.bf16.mxu1 %v1920_v52  ;;  %s2005_s12 = scalar_lea.vmem %s1509_s11, 32  ;;  %p2010_p3 = scmp.lt.s32.totalorder %s1509_s11, %s1509_s11 }
  0x80   :  { %p2006_p2 = scmp.ne.s32.totalorder %s1509_s11, %s2005_s12  ;;  %p2011_p4 = scmp.lt.s32.totalorder %s2005_s12, %s2005_s12 }
  0x81   :  { %1748 = vmatpush3.bf16.msra.mxu0 %v1921_v53 }
  0x82   :  { %1749 = vmatprep.subr.bf16.mxu0 %v1923_v54  ;;  %1770 = vmatpush3.bf16.msra.mxu1 %v1922_v55  ;;  %p2012_p5 = por %p2011_p4, %p2010_p3 }
  0x83   :  { %1771 = vmatprep.subr.bf16.mxu1 %v1924_v56 }
  0x84   :  { %p2013_p6 = pnand %p2012_p5, %p2006_p2 }
  0x85   :  { %1750 = vmatpush3.bf16.msra.mxu0 %v1925_v58 }
  0x86   :  { %1779 = vmatprep.subr.bf16.mxu0 %v1928_v61  ;;  %1772 = vmatpush3.bf16.msra.mxu1 %v1926_v62 }
  0x87   :  { %1801 = vmatprep.subr.bf16.mxu1 %v1929_v2 }
  0x88   :  { %1374 = vmatmul.mubr.bf16.vlgmr.msra.gmra.mrb[8].mxu0 %v142_v1 }
  0x89   :  { %1780 = vmatpush3.bf16.msra.mxu0 %v1930_v5  ;;  %1414 = vmatmul.mubr.bf16.vlgmr.msra.gmra.mrb[8].mxu1 %v144_v6 }
  0x8a   :  { %1781 = vmatprep.subr.bf16.mxu0 %v1932_v7  ;;  %1802 = vmatpush3.bf16.msra.mxu1 %v1931_v9 }
  0x8b   :  { %1803 = vmatprep.subr.bf16.mxu1 %v1933_v10  ;;  %1453 = vmatprep.mubr.bf16.mxu0 %v147_v44 }
  0x8c   :  { %1493 = vmatprep.mubr.bf16.mxu1 %v149_v47 }
  0x8d   :  { %1782 = vmatpush3.bf16.msra.mxu0 %v1934_v11 }
  0x8e   :  { %1783 = vmatprep.subr.bf16.mxu0 %v1936_v12  ;;  %1804 = vmatpush3.bf16.msra.mxu1 %v1935_v13 }
  0x8f   :  { %1805 = vmatprep.subr.bf16.mxu1 %v1937_v14 }
  0x91   :  { %1784 = vmatpush3.bf16.msra.mxu0 %v1938_v15 }
  0x92   :  { %1785 = vmatprep.subr.bf16.mxu0 %v1940_v16  ;;  %1806 = vmatpush3.bf16.msra.mxu1 %v1939_v17 }
  0x93   :  { %1807 = vmatprep.subr.bf16.mxu1 %v1941_v18 }
  0x95   :  { %1786 = vmatpush3.bf16.msra.mxu0 %v1942_v19 }
  0x96   :  { %1787 = vmatprep.subr.bf16.mxu0 %v1944_v20  ;;  %1808 = vmatpush3.bf16.msra.mxu1 %v1943_v21 }
  0x97   :  { %1809 = vmatprep.subr.bf16.mxu1 %v1945_v22 }
  0x99   :  { %1788 = vmatpush3.bf16.msra.mxu0 %v1946_v23 }
  0x9a   :  { %1789 = vmatprep.subr.bf16.mxu0 %v1948_v24  ;;  %1810 = vmatpush3.bf16.msra.mxu1 %v1947_v25 }
  0x9b   :  { %1811 = vmatprep.subr.bf16.mxu1 %v1949_v26 }
  0x9d   :  { %1790 = vmatpush3.bf16.msra.mxu0 %v1950_v27 }
  0x9e   :  { %1791 = vmatprep.subr.bf16.mxu0 %v1952_v28  ;;  %1812 = vmatpush3.bf16.msra.mxu1 %v1951_v29 }
  0x9f   :  { %1813 = vmatprep.subr.bf16.mxu1 %v1953_v30 }
  0xa1   :  { %1792 = vmatpush3.bf16.msra.mxu0 %v1954_v31 }
  0xa2   :  { %1793 = vmatprep.subr.bf16.mxu0 %v1956_v32  ;;  %1814 = vmatpush3.bf16.msra.mxu1 %v1955_v33 }
  0xa3   :  { %1815 = vmatprep.subr.bf16.mxu1 %v1957_v34 }
  0xa5   :  { %1794 = vmatpush3.bf16.msra.mxu0 %v1958_v36 }
  0xa6   :  { %1816 = vmatpush3.bf16.msra.mxu1 %v1959_v40 }
  0xa8   :  { %1454 = vmatmul.mubr.bf16.vlgmr.msra.gmra.mrb[12].mxu0 %v146_v43 }
  0xa9   :  { %1494 = vmatmul.mubr.bf16.vlgmr.msra.gmra.mrb[12].mxu1 %v148_v46 }
 0x11b   :  { %v1663_v48 = vpop.f32.mrb[0].mxu0 }
 0x11c   :  { %v1664_v50 = vpop.f32.mrb[1].mxu0  ;;  %v1685_v51 = vpop.f32.mrb[0].mxu1 }
 0x11d   :  { %v1665_v52 = vadd.f32 %v1664_v50, %v1663_v48  ;;  %v1666_v35 = vpop.f32.mrb[2].mxu0  ;;  %v1686_v53 = vpop.f32.mrb[1].mxu1 }
 0x11e   :  { %v1667_v54 = vpop.f32.mrb[3].mxu0  ;;  %v1687_v56 = vadd.f32 %v1686_v53, %v1685_v51  ;;  %v1688_v57 = vpop.f32.mrb[2].mxu1 }
 0x11f   :  { %v1216_v55 = vadd.f32 %v1665_v52, %v1518_v49  ;;  %v1689_v58 = vpop.f32.mrb[3].mxu1 }
 0x121   :  { %v1256_v59 = vadd.f32 %v1687_v56, %v1216_v55 }
 0x13b   :  { %v1707_v60 = vpop.f32.mrb[4].mxu0 }
 0x13c   :  { %v1708_v61 = vpop.f32.mrb[5].mxu0  ;;  %v1729_v62 = vpop.f32.mrb[4].mxu1 }
 0x13d   :  { %v1709_v63 = vadd.f32 %v1708_v61, %v1707_v60  ;;  %v1710_v0 = vpop.f32.mrb[6].mxu0  ;;  %v1730_v1 = vpop.f32.mrb[5].mxu1 }
 0x13e   :  { %v1711_v2 = vpop.f32.mrb[7].mxu0  ;;  %v1731_v4 = vadd.f32 %v1730_v1, %v1729_v62  ;;  %v1732_v5 = vpop.f32.mrb[6].mxu1 }
 0x13f   :  { %v1296_v3 = vadd.f32 %v1709_v63, %v1256_v59  ;;  %v1733_v6 = vpop.f32.mrb[7].mxu1 }
 0x141   :  { %v1336_v7 = vadd.f32 %v1731_v4, %v1296_v3 }
 0x15b   :  { %v1751_v8 = vpop.f32.mrb[8].mxu0 }
 0x15c   :  { %v1752_v9 = vpop.f32.mrb[9].mxu0  ;;  %v1773_v10 = vpop.f32.mrb[8].mxu1 }
 0x15d   :  { %v1753_v11 = vadd.f32 %v1752_v9, %v1751_v8  ;;  %v1754_v12 = vpop.f32.mrb[10].mxu0  ;;  %v1774_v13 = vpop.f32.mrb[9].mxu1 }
 0x15e   :  { %v1755_v14 = vpop.f32.mrb[11].mxu0  ;;  %v1775_v16 = vadd.f32 %v1774_v13, %v1773_v10  ;;  %v1776_v17 = vpop.f32.mrb[10].mxu1 }
 0x15f   :  { %v1376_v15 = vadd.f32 %v1753_v11, %v1336_v7  ;;  %v1777_v18 = vpop.f32.mrb[11].mxu1 }
 0x161   :  { %v1416_v19 = vadd.f32 %v1775_v16, %v1376_v15 }
 0x17b   :  { %v1795_v20 = vpop.f32.mrb[12].mxu0 }
 0x17c   :  { %v1796_v21 = vpop.f32.mrb[13].mxu0  ;;  %v1817_v22 = vpop.f32.mrb[12].mxu1 }
 0x17d   :  { %v1797_v23 = vadd.f32 %v1796_v21, %v1795_v20  ;;  %v1798_v24 = vpop.f32.mrb[14].mxu0  ;;  %v1818_v25 = vpop.f32.mrb[13].mxu1 }
 0x17e   :  { %v1799_v26 = vpop.f32.mrb[15].mxu0  ;;  %v1819_v28 = vadd.f32 %v1818_v25, %v1817_v22  ;;  %v1820_v29 = vpop.f32.mrb[14].mxu1 }
 0x17f   :  { %v1456_v27 = vadd.f32 %v1797_v23, %v1416_v19  ;;  %v1821_v30 = vpop.f32.mrb[15].mxu1 }
 0x181   :  { %v1496_v31 = vadd.f32 %v1819_v28, %v1456_v27 }
 0x183   :  { %1501 = vst [vmem:[#allocation7] sm:$0x3] %v1496_v31 }
 0x184   :  { %2016 = shalt.err (!%p2013_p6)
}
 0x185   :  { %s2017_s15 = scalar_lea.hbm %s2118_s3, 32 }
 0x186   :  { %p2018_p7 = scmp.ne.s32.totalorder %s2118_s3, %s2017_s15  ;;  %p2021_p8 = scmp.lt.u32.totalorder %s2017_s15, %s2118_s3 }
 0x188   :  { %p2023_p9 = pnand %p2021_p8, %p2018_p7 }
 0x18a   :  { %2026 = shalt.err (!%p2023_p9)
}
 0x18b   :  { %1511 = dma.vmem_to_hbm [thread:$0]  %s1509_s11, 32, %s2118_s3, [#allocation4]  }
 0x18c   :  { %2031 = dma.done.wait [#allocation4], 32  }
 0x18d   :  { %2032 = vsyncadd [#allocation4], 4294967264 }
 0x18e   :  { %1515 = vsyncpa [#allocation3], 1 }
 0x18f   :  { %1516 = vsyncpa [#allocation6], 1 }
 0x190   :  { %1517 = vsyncpa [#allocation4], 1 }

</bundles_post_ra>
